<compile_context>
chip_gen: v7x
topology: tpu7x:2x2x1
jax: 0.10.0
libtpu: 0.0.40
codegen_flags: <defaults>
</compile_context>

<pallas_src>
import jax
import jax.numpy as jnp
from jax.experimental import pallas as pl
from jax.experimental.pallas import tpu as pltpu


def _cdiv(a, b):
    return -(-a // b)


def _round_up(n, m):
    return ((n + m - 1) // m) * m


def _mlp_kernel(x_ref, w1_ref, b1_ref, w2_ref, b2_ref, w3_ref, b3_ref, o_ref):
    # Layer 1: [tb, D] @ [D, 64] on MXU, f32 accumulation; bias add + ReLU on VPU in f32.
    h = jnp.dot(x_ref[...], w1_ref[...], preferred_element_type=jnp.float32)
    h = jnp.maximum(h + b1_ref[...], 0.0)
    # Layer 2: [tb, 64] @ [64, 16]
    h = jnp.dot(h.astype(w2_ref.dtype), w2_ref[...], preferred_element_type=jnp.float32)
    h = jnp.maximum(h + b2_ref[...], 0.0)
    # Layer 3: [tb, 16] @ [16, 4] (tiny; the kernel is memory-bound, MXU has plenty of slack)
    h = jnp.dot(h.astype(w3_ref.dtype), w3_ref[...], preferred_element_type=jnp.float32)
    h = jnp.maximum(h + b3_ref[...], 0.0)
    o_ref[...] = h.astype(o_ref.dtype)


# Only split a batch that fits in one tile when it is at least this many rows
# (so both v7x TensorCores get meaningful work); below this a single step is cheaper.
_MIN_SPLIT_ROWS = 2048


def _tpu_tile_defaults():
    """Generation-aware (max_batch_tile, vmem_limit_bytes).

    v7x: 64 MiB physical VMEM per TC  -> cap tile at 4096 rows, 32 MiB scoped limit.
    v5e/v6e: 128 MiB physical VMEM    -> 8192-row tiles, 64 MiB scoped limit.
    Budget per step (f32, lane-padded to 128 lanes): ~2 x-bufs + 2 out-bufs +
    intermediates ~= 7 * tb * 512 B  =>  ~14.7 MiB at tb=4096, ~29 MiB at tb=8192.
    """
    try:
        vmem_phys = pltpu.get_tpu_info().vmem_capacity_bytes
    except Exception:
        vmem_phys = 64 << 20  # conservative (v7x-safe) fallback
    if vmem_phys > (64 << 20):
        return 8192, 64 << 20
    return 4096, 32 << 20


def classifier_forward(x, params, *, max_batch_tile=None, vmem_limit_bytes=None):
    """Fused MLP forward: ReLU(ReLU(ReLU(x@W1+b1)@W2+b2)@W3+b3).

    x: [B, input_dim].  The compute/stream dtype follows x.dtype: pass bf16 x (already
       bf16 in HBM) for the halved-bandwidth path; casting here would just add a full
       extra HBM pass, so we never do it.
    params: (w1, b1, w2, b2, w3, b3) with w_i transposed ([in, out]) and b_i [1, out].
    """
    w1, b1, w2, b2, w3, b3 = params
    out_dtype = x.dtype
    # Resident weights are tiny; casting them to the streaming dtype is free.
    w1, w2, w3 = (w.astype(x.dtype) for w in (w1, w2, w3))
    b1, b2, b3 = (b.astype(jnp.float32) for b in (b1, b2, b3))

    B, D = x.shape
    H1, H2, OUT = w1.shape[1], w2.shape[1], w3.shape[1]

    default_tile, default_vmem = _tpu_tile_defaults()
    max_tile = max_batch_tile or default_tile
    vmem_limit = vmem_limit_bytes or default_vmem

    # Tile choice:
    #  * B fits in one tile -> single block with tb == B (block dim == array dim is
    #    always legal, including ragged B), unless B is large enough to split across
    #    both v7x TensorCores.
    #  * Otherwise an even number of >=8-row tiles; the partial last block's OOB rows
    #    are garbage reads whose outputs are masked on store (rows are independent).
    if B > max_tile:
        n_steps = _cdiv(B, max_tile)
    elif B >= 2 * _MIN_SPLIT_ROWS:
        n_steps = 2
    else:
        n_steps = 1
    if n_steps > 1 and n_steps % 2:
        n_steps += 1  # even grid so ("parallel",) balances the two v7x TCs
    tb = B if n_steps == 1 else _round_up(_cdiv(B, n_steps), 8)
    grid = (_cdiv(B, tb),)

    x_itemsize = jnp.dtype(x.dtype).itemsize
    w_bytes = sum(int(a.size) * jnp.dtype(a.dtype).itemsize
                  for a in (w1, b1, w2, b2, w3, b3))
    cost = pl.CostEstimate(
        flops=2 * B * (D * H1 + H1 * H2 + H2 * OUT),
        transcendentals=0,
        bytes_accessed=B * D * x_itemsize
        + B * OUT * jnp.dtype(out_dtype).itemsize
        + w_bytes,
    )

    def _call(buffered_weights):
        def wspec(shape):
            if buffered_weights:
                # Constant index_map => resident across the grid; single buffer is enough.
                return pl.BlockSpec(shape, lambda i: (0, 0), pipeline_mode=pl.Buffered(1))
            return pl.BlockSpec(shape, lambda i: (0, 0))

        return pl.pallas_call(
            _mlp_kernel,
            out_shape=jax.ShapeDtypeStruct((B, OUT), out_dtype),
            grid=grid,
            in_specs=[
                pl.BlockSpec((tb, D), lambda i: (i, 0)),  # x tile: streamed, double-buffered
                wspec((D, H1)),   # W1 (resident)
                wspec((1, H1)),   # b1
                wspec((H1, H2)),  # W2
                wspec((1, H2)),   # b2
                wspec((H2, OUT)), # W3
                wspec((1, OUT)),  # b3
            ],
            out_specs=pl.BlockSpec((tb, OUT), lambda i: (i, 0)),
            compiler_params=pltpu.CompilerParams(
                dimension_semantics=("parallel",),  # megacore-shard the batch axis (v7x)
                vmem_limit_bytes=vmem_limit,
            ),
            cost_estimate=cost,
        )(x, w1, b1, w2, b2, w3, b3)

    try:
        return _call(buffered_weights=True)
    except Exception:
        # Fallback for jax versions without BlockSpec pipeline_mode / pl.Buffered(1).
        return _call(buffered_weights=False)


def init_params(key, input_dim, target="discrete"):
    """Deterministic init mimicking PyTorch's default Linear init (U[-1/sqrt(fan_in), +])."""
    if target == "discrete":
        dims = [(input_dim, 64), (64, 16), (16, 4)]
    else:
        dims = [(256, 64), (64, 16), (16, 3)]
    params = []
    for idx, (fan_in, fan_out) in enumerate(dims):
        kw, kb = jax.random.split(jax.random.fold_in(key, idx))
        bound = 1.0 / (fan_in ** 0.5)
        w = jax.random.uniform(kw, (fan_in, fan_out), jnp.float32, -bound, bound)
        b = jax.random.uniform(kb, (1, fan_out), jnp.float32, -bound, bound)
        params += [w, b]
    return tuple(params)


def reference_forward(x, params):
    w1, b1, w2, b2, w3, b3 = params
    h = jnp.maximum(x @ w1 + b1, 0.0)
    h = jnp.maximum(h @ w2 + b2, 0.0)
    return jnp.maximum(h @ w3 + b3, 0.0)


if __name__ == "__main__":
    key = jax.random.PRNGKey(0)
    B, INPUT_DIM = 8, 32  # small shapes; target='discrete' => output dim 4

    params = init_params(key, INPUT_DIM, target="discrete")
    x = jax.random.normal(jax.random.fold_in(key, 123), (B, INPUT_DIM), jnp.float32)

    # f32 path, tiny batch (single grid step, block dim == array dim).
    out = jax.block_until_ready(classifier_forward(x, params))
    ref = reference_forward(x, params)
    assert out.shape == (B, 4), out.shape
    assert jnp.allclose(out, ref, atol=1e-5, rtol=1e-5), "mismatch vs reference (f32)"

    # Ragged batch, forced multi-step grid with a partial last tile
    # (exercises masked OOB writes -- no jnp.pad / extra HBM pass).
    B2 = 1000
    x2 = jax.random.normal(jax.random.fold_in(key, 456), (B2, INPUT_DIM), jnp.float32)
    out2 = jax.block_until_ready(classifier_forward(x2, params, max_batch_tile=256))
    ref2 = reference_forward(x2, params)
    assert out2.shape == (B2, 4), out2.shape
    assert jnp.allclose(out2, ref2, atol=1e-5, rtol=1e-5), "mismatch vs reference (ragged)"

    # bf16 streaming path: x already arrives as bf16 (no wrapper-side cast inside the
    # forward); f32 accumulation/bias/ReLU are preserved, loose tolerance check.
    x2_bf16 = x2.astype(jnp.bfloat16)
    out_bf16 = jax.block_until_ready(classifier_forward(x2_bf16, params))
    assert out_bf16.shape == (B2, 4), out_bf16.shape
    assert jnp.allclose(out_bf16.astype(jnp.float32), ref2, atol=1e-1, rtol=1e-1), \
        "mismatch vs reference (bf16)"

    print("KERNEL_OK")
</pallas_src>

<mosaic_0001>
module attributes {stable_mosaic.version = 11 : i64} {
  func.func @_mlp_kernel(%arg0: i32, %arg1: memref<8x32xf32, #tpu.memory_space<vmem>>, %arg2: memref<32x64xf32, #tpu.memory_space<vmem>>, %arg3: memref<1x64xf32, #tpu.memory_space<vmem>>, %arg4: memref<64x16xf32, #tpu.memory_space<vmem>>, %arg5: memref<1x16xf32, #tpu.memory_space<vmem>>, %arg6: memref<16x4xf32, #tpu.memory_space<vmem>>, %arg7: memref<1x4xf32, #tpu.memory_space<vmem>>, %arg8: memref<8x4xf32, #tpu.memory_space<vmem>>) attributes {dimension_semantics = [#tpu.dimension_semantics<parallel>], iteration_bounds = array<i64: 1>, scalar_prefetch = 0 : i64, scratch_operands = 0 : i64, tpu.core_type = #tpu.core_type<tc>, window_params = [{transform_indices = @transform_0, window_bounds = array<i64: 8, 32>}, {pipeline_mode = #tpu.pipeline_mode<synchronous>, transform_indices = @transform_1, window_bounds = array<i64: 32, 64>}, {pipeline_mode = #tpu.pipeline_mode<synchronous>, transform_indices = @transform_2, window_bounds = array<i64: 1, 64>}, {pipeline_mode = #tpu.pipeline_mode<synchronous>, transform_indices = @transform_3, window_bounds = array<i64: 64, 16>}, {pipeline_mode = #tpu.pipeline_mode<synchronous>, transform_indices = @transform_4, window_bounds = array<i64: 1, 16>}, {pipeline_mode = #tpu.pipeline_mode<synchronous>, transform_indices = @transform_5, window_bounds = array<i64: 16, 4>}, {pipeline_mode = #tpu.pipeline_mode<synchronous>, transform_indices = @transform_6, window_bounds = array<i64: 1, 4>}, {transform_indices = @transform_7, window_bounds = array<i64: 8, 4>}]} {
    %c0 = arith.constant 0 : index
    %c0_0 = arith.constant 0 : index
    %0 = vector.load %arg1[%c0, %c0_0] : memref<8x32xf32, #tpu.memory_space<vmem>>, vector<8x32xf32>
    %c0_1 = arith.constant 0 : index
    %c0_2 = arith.constant 0 : index
    %1 = vector.load %arg2[%c0_1, %c0_2] : memref<32x64xf32, #tpu.memory_space<vmem>>, vector<32x64xf32>
    %cst = arith.constant dense<0.000000e+00> : vector<8x64xf32>
    %2 = tpu.matmul %0, %1, %cst {dimension_numbers = #tpu.dot_dimension_numbers<[1], [0], [0], [1], [0, 0, 1, 1], [], []>} : vector<8x32xf32>, vector<32x64xf32>, vector<8x64xf32> -> vector<8x64xf32>
    %c0_3 = arith.constant 0 : index
    %c0_4 = arith.constant 0 : index
    %3 = vector.load %arg3[%c0_3, %c0_4] : memref<1x64xf32, #tpu.memory_space<vmem>>, vector<1x64xf32>
    %4 = vector.broadcast %3 : vector<1x64xf32> to vector<8x64xf32>
    %5 = arith.addf %2, %4 : vector<8x64xf32>
    %cst_5 = arith.constant 0.000000e+00 : f32
    %6 = vector.broadcast %cst_5 : f32 to vector<8x64xf32>
    %7 = arith.maximumf %5, %6 : vector<8x64xf32>
    %c0_6 = arith.constant 0 : index
    %c0_7 = arith.constant 0 : index
    %8 = vector.load %arg4[%c0_6, %c0_7] : memref<64x16xf32, #tpu.memory_space<vmem>>, vector<64x16xf32>
    %cst_8 = arith.constant dense<0.000000e+00> : vector<8x16xf32>
    %9 = tpu.matmul %7, %8, %cst_8 {dimension_numbers = #tpu.dot_dimension_numbers<[1], [0], [0], [1], [0, 0, 1, 1], [], []>} : vector<8x64xf32>, vector<64x16xf32>, vector<8x16xf32> -> vector<8x16xf32>
    %c0_9 = arith.constant 0 : index
    %c0_10 = arith.constant 0 : index
    %10 = vector.load %arg5[%c0_9, %c0_10] : memref<1x16xf32, #tpu.memory_space<vmem>>, vector<1x16xf32>
    %11 = vector.broadcast %10 : vector<1x16xf32> to vector<8x16xf32>
    %12 = arith.addf %9, %11 : vector<8x16xf32>
    %cst_11 = arith.constant 0.000000e+00 : f32
    %13 = vector.broadcast %cst_11 : f32 to vector<8x16xf32>
    %14 = arith.maximumf %12, %13 : vector<8x16xf32>
    %c0_12 = arith.constant 0 : index
    %c0_13 = arith.constant 0 : index
    %15 = vector.load %arg6[%c0_12, %c0_13] : memref<16x4xf32, #tpu.memory_space<vmem>>, vector<16x4xf32>
    %cst_14 = arith.constant dense<0.000000e+00> : vector<8x4xf32>
    %16 = tpu.matmul %14, %15, %cst_14 {dimension_numbers = #tpu.dot_dimension_numbers<[1], [0], [0], [1], [0, 0, 1, 1], [], []>} : vector<8x16xf32>, vector<16x4xf32>, vector<8x4xf32> -> vector<8x4xf32>
    %c0_15 = arith.constant 0 : index
    %c0_16 = arith.constant 0 : index
    %17 = vector.load %arg7[%c0_15, %c0_16] : memref<1x4xf32, #tpu.memory_space<vmem>>, vector<1x4xf32>
    %18 = vector.broadcast %17 : vector<1x4xf32> to vector<8x4xf32>
    %19 = arith.addf %16, %18 : vector<8x4xf32>
    %cst_17 = arith.constant 0.000000e+00 : f32
    %20 = vector.broadcast %cst_17 : f32 to vector<8x4xf32>
    %21 = arith.maximumf %19, %20 : vector<8x4xf32>
    %c0_18 = arith.constant 0 : index
    %c0_19 = arith.constant 0 : index
    %22 = vector.load %arg8[%c0_18, %c0_19] : memref<8x4xf32, #tpu.memory_space<vmem>>, vector<8x4xf32>
    tpu.vector_store %arg8[%c0_18, %c0_19], %21 {strides = array<i32>} : memref<8x4xf32, #tpu.memory_space<vmem>>, vector<8x4xf32>,
    return
  }
  func.func @transform_0(%arg0: i32) -> (i32, i32) {
    %c0_i32 = arith.constant 0 : i32
    %c0_i32_0 = arith.constant 0 : i32
    return %arg0, %c0_i32 : i32, i32
  }
  func.func @transform_1(%arg0: i32) -> (i32, i32) {
    %c0_i32 = arith.constant 0 : i32
    %c0_i32_0 = arith.constant 0 : i32
    %c0_i32_1 = arith.constant 0 : i32
    return %c0_i32, %c0_i32_0 : i32, i32
  }
  func.func @transform_2(%arg0: i32) -> (i32, i32) {
    %c0_i32 = arith.constant 0 : i32
    %c0_i32_0 = arith.constant 0 : i32
    %c0_i32_1 = arith.constant 0 : i32
    return %c0_i32, %c0_i32_0 : i32, i32
  }
  func.func @transform_3(%arg0: i32) -> (i32, i32) {
    %c0_i32 = arith.constant 0 : i32
    %c0_i32_0 = arith.constant 0 : i32
    %c0_i32_1 = arith.constant 0 : i32
    return %c0_i32, %c0_i32_0 : i32, i32
  }
  func.func @transform_4(%arg0: i32) -> (i32, i32) {
    %c0_i32 = arith.constant 0 : i32
    %c0_i32_0 = arith.constant 0 : i32
    %c0_i32_1 = arith.constant 0 : i32
    return %c0_i32, %c0_i32_0 : i32, i32
  }
  func.func @transform_5(%arg0: i32) -> (i32, i32) {
    %c0_i32 = arith.constant 0 : i32
    %c0_i32_0 = arith.constant 0 : i32
    %c0_i32_1 = arith.constant 0 : i32
    return %c0_i32, %c0_i32_0 : i32, i32
  }
  func.func @transform_6(%arg0: i32) -> (i32, i32) {
    %c0_i32 = arith.constant 0 : i32
    %c0_i32_0 = arith.constant 0 : i32
    %c0_i32_1 = arith.constant 0 : i32
    return %c0_i32, %c0_i32_0 : i32, i32
  }
  func.func @transform_7(%arg0: i32) -> (i32, i32) {
    %c0_i32 = arith.constant 0 : i32
    %c0_i32_0 = arith.constant 0 : i32
    return %arg0, %c0_i32 : i32, i32
  }
}

module attributes {stable_mosaic.version = 11 : i64} {
  func.func @_mlp_kernel(%arg0: i32, %arg1: memref<8x32xf32, #tpu.memory_space<vmem>>, %arg2: memref<32x64xf32, #tpu.memory_space<vmem>>, %arg3: memref<1x64xf32, #tpu.memory_space<vmem>>, %arg4: memref<64x16xf32, #tpu.memory_space<vmem>>, %arg5: memref<1x16xf32, #tpu.memory_space<vmem>>, %arg6: memref<16x4xf32, #tpu.memory_space<vmem>>, %arg7: memref<1x4xf32, #tpu.memory_space<vmem>>, %arg8: memref<8x4xf32, #tpu.memory_space<vmem>>) attributes {dimension_semantics = [#tpu.dimension_semantics<parallel>], iteration_bounds = array<i64: 1>, scalar_prefetch = 0 : i64, scratch_operands = 0 : i64, tpu.core_type = #tpu.core_type<tc>, window_params = [{transform_indices = @transform_0, window_bounds = array<i64: 8, 32>}, {pipeline_mode = #tpu.pipeline_mode<synchronous>, transform_indices = @transform_1, window_bounds = array<i64: 32, 64>}, {pipeline_mode = #tpu.pipeline_mode<synchronous>, transform_indices = @transform_2, window_bounds = array<i64: 1, 64>}, {pipeline_mode = #tpu.pipeline_mode<synchronous>, transform_indices = @transform_3, window_bounds = array<i64: 64, 16>}, {pipeline_mode = #tpu.pipeline_mode<synchronous>, transform_indices = @transform_4, window_bounds = array<i64: 1, 16>}, {pipeline_mode = #tpu.pipeline_mode<synchronous>, transform_indices = @transform_5, window_bounds = array<i64: 16, 4>}, {pipeline_mode = #tpu.pipeline_mode<synchronous>, transform_indices = @transform_6, window_bounds = array<i64: 1, 4>}, {transform_indices = @transform_7, window_bounds = array<i64: 8, 4>}]} {
    %c0 = arith.constant 0 : index
    %c0_0 = arith.constant 0 : index
    %0 = vector.load %arg1[%c0, %c0_0] : memref<8x32xf32, #tpu.memory_space<vmem>>, vector<8x32xf32>
    %c0_1 = arith.constant 0 : index
    %c0_2 = arith.constant 0 : index
    %1 = vector.load %arg2[%c0_1, %c0_2] : memref<32x64xf32, #tpu.memory_space<vmem>>, vector<32x64xf32>
    %cst = arith.constant dense<0.000000e+00> : vector<8x64xf32>
    %2 = tpu.matmul %0, %1, %cst {dimension_numbers = #tpu.dot_dimension_numbers<[1], [0], [0], [1], [0, 0, 1, 1], [], []>} : vector<8x32xf32>, vector<32x64xf32>, vector<8x64xf32> -> vector<8x64xf32>
    %c0_3 = arith.constant 0 : index
    %c0_4 = arith.constant 0 : index
    %3 = vector.load %arg3[%c0_3, %c0_4] : memref<1x64xf32, #tpu.memory_space<vmem>>, vector<1x64xf32>
    %4 = vector.broadcast %3 : vector<1x64xf32> to vector<8x64xf32>
    %5 = arith.addf %2, %4 : vector<8x64xf32>
    %cst_5 = arith.constant 0.000000e+00 : f32
    %6 = vector.broadcast %cst_5 : f32 to vector<8x64xf32>
    %7 = arith.maximumf %5, %6 : vector<8x64xf32>
    %c0_6 = arith.constant 0 : index
    %c0_7 = arith.constant 0 : index
    %8 = vector.load %arg4[%c0_6, %c0_7] : memref<64x16xf32, #tpu.memory_space<vmem>>, vector<64x16xf32>
    %cst_8 = arith.constant dense<0.000000e+00> : vector<8x16xf32>
    %9 = tpu.matmul %7, %8, %cst_8 {dimension_numbers = #tpu.dot_dimension_numbers<[1], [0], [0], [1], [0, 0, 1, 1], [], []>} : vector<8x64xf32>, vector<64x16xf32>, vector<8x16xf32> -> vector<8x16xf32>
    %c0_9 = arith.constant 0 : index
    %c0_10 = arith.constant 0 : index
    %10 = vector.load %arg5[%c0_9, %c0_10] : memref<1x16xf32, #tpu.memory_space<vmem>>, vector<1x16xf32>
    %11 = vector.broadcast %10 : vector<1x16xf32> to vector<8x16xf32>
    %12 = arith.addf %9, %11 : vector<8x16xf32>
    %cst_11 = arith.constant 0.000000e+00 : f32
    %13 = vector.broadcast %cst_11 : f32 to vector<8x16xf32>
    %14 = arith.maximumf %12, %13 : vector<8x16xf32>
    %c0_12 = arith.constant 0 : index
    %c0_13 = arith.constant 0 : index
    %15 = vector.load %arg6[%c0_12, %c0_13] : memref<16x4xf32, #tpu.memory_space<vmem>>, vector<16x4xf32>
    %cst_14 = arith.constant dense<0.000000e+00> : vector<8x4xf32>
    %16 = tpu.matmul %14, %15, %cst_14 {dimension_numbers = #tpu.dot_dimension_numbers<[1], [0], [0], [1], [0, 0, 1, 1], [], []>} : vector<8x16xf32>, vector<16x4xf32>, vector<8x4xf32> -> vector<8x4xf32>
    %c0_15 = arith.constant 0 : index
    %c0_16 = arith.constant 0 : index
    %17 = vector.load %arg7[%c0_15, %c0_16] : memref<1x4xf32, #tpu.memory_space<vmem>>, vector<1x4xf32>
    %18 = vector.broadcast %17 : vector<1x4xf32> to vector<8x4xf32>
    %19 = arith.addf %16, %18 : vector<8x4xf32>
    %cst_17 = arith.constant 0.000000e+00 : f32
    %20 = vector.broadcast %cst_17 : f32 to vector<8x4xf32>
    %21 = arith.maximumf %19, %20 : vector<8x4xf32>
    %c0_18 = arith.constant 0 : index
    %c0_19 = arith.constant 0 : index
    %22 = vector.load %arg8[%c0_18, %c0_19] : memref<8x4xf32, #tpu.memory_space<vmem>>, vector<8x4xf32>
    tpu.vector_store %arg8[%c0_18, %c0_19], %21 {strides = array<i32>} : memref<8x4xf32, #tpu.memory_space<vmem>>, vector<8x4xf32>,
    return
  }
  func.func @transform_0(%arg0: i32) -> (i32, i32) {
    %c0_i32 = arith.constant 0 : i32
    %c0_i32_0 = arith.constant 0 : i32
    return %arg0, %c0_i32 : i32, i32
  }
  func.func @transform_1(%arg0: i32) -> (i32, i32) {
    %c0_i32 = arith.constant 0 : i32
    %c0_i32_0 = arith.constant 0 : i32
    %c0_i32_1 = arith.constant 0 : i32
    return %c0_i32, %c0_i32_0 : i32, i32
  }
  func.func @transform_2(%arg0: i32) -> (i32, i32) {
    %c0_i32 = arith.constant 0 : i32
    %c0_i32_0 = arith.constant 0 : i32
    %c0_i32_1 = arith.constant 0 : i32
    return %c0_i32, %c0_i32_0 : i32, i32
  }
  func.func @transform_3(%arg0: i32) -> (i32, i32) {
    %c0_i32 = arith.constant 0 : i32
    %c0_i32_0 = arith.constant 0 : i32
    %c0_i32_1 = arith.constant 0 : i32
    return %c0_i32, %c0_i32_0 : i32, i32
  }
  func.func @transform_4(%arg0: i32) -> (i32, i32) {
    %c0_i32 = arith.constant 0 : i32
    %c0_i32_0 = arith.constant 0 : i32
    %c0_i32_1 = arith.constant 0 : i32
    return %c0_i32, %c0_i32_0 : i32, i32
  }
  func.func @transform_5(%arg0: i32) -> (i32, i32) {
    %c0_i32 = arith.constant 0 : i32
    %c0_i32_0 = arith.constant 0 : i32
    %c0_i32_1 = arith.constant 0 : i32
    return %c0_i32, %c0_i32_0 : i32, i32
  }
  func.func @transform_6(%arg0: i32) -> (i32, i32) {
    %c0_i32 = arith.constant 0 : i32
    %c0_i32_0 = arith.constant 0 : i32
    %c0_i32_1 = arith.constant 0 : i32
    return %c0_i32, %c0_i32_0 : i32, i32
  }
  func.func @transform_7(%arg0: i32) -> (i32, i32) {
    %c0_i32 = arith.constant 0 : i32
    %c0_i32_0 = arith.constant 0 : i32
    return %arg0, %c0_i32 : i32, i32
  }
}

</mosaic_0001>

<bundles_post_ra>
// kernel: tpu_custom_call.1
= control target key start
LH: loop header
LB: loop body
LE: loop exit
PB: predicated region body
PF: predicated region fallthrough
CT: control target
= control target key end

     0   :  { %v377_v0 = vmov 0.0|0.0   ;;  %vm378_vm0 = vmmov 0   ;;  %v379_v4 = vmov 0.0   ;;  %vm38_vm1 = vcmask 261120   ;;  %s480_s1 = inlined_call_operand.vmem [shape: f32[32,64], index: 1, kind: input, shape index: {}]   ;;  %s481_s3 = inlined_call_operand.vmem [shape: f32[64,16], index: 3, kind: input, shape index: {}]   ;;  %s482_s0 = inlined_call_operand.vmem [shape: f32[8,32], index: 0, kind: input, shape index: {}]   ;;  %s483_s2 = inlined_call_operand.vmem [shape: f32[1,64], index: 2, kind: input, shape index: {}]   ;;  %s484_s5 = inlined_call_operand.vmem [shape: f32[16,4], index: 5, kind: input, shape index: {}]   ;;  %s485_s4 = inlined_call_operand.vmem [shape: f32[1,16], index: 4, kind: input, shape index: {}]   ;;  %s486_s6 = inlined_call_operand.vmem [shape: f32[1,4], index: 6, kind: input, shape index: {}]   ;;  %s487_s7 = inlined_call_operand.vmem [shape: f32[8,4], index: 7, kind: output, shape index: {}]  }
   0x1   :  { %353 = vmatprep.subr.bf16.mxu0 %v377_v0  ;;  %v27_v1 = vld [vmem:[%s480_s1] sm:$0xff]  ;;  %v28_v2 = vld [vmem:[%s480_s1 + $0x8] sm:$0xff]  ;;  %v29_v3 = vld [vmem:[%s480_s1 + $0x10] sm:$0xff]  ;;  %324 = vmatprep.mubr.msk.f32.mxu0 %vm378_vm0, %v379_v4  ;;  %vm128_vm2 = vcmask 523264   ;;  %vm212_vm3 = vcmask 130048   ;;  %vm287_vm4 = vcmask 31744  }
   0x2   :  { %v354_v5 = vpack.c.bf16 %v28_v2, %v27_v1  ;;  %v30_v6 = vld [vmem:[%s480_s1 + $0x18] sm:$0xff]  ;;  %359 = vmatprep.subr.bf16.mxu1 %v377_v0  ;;  %v113_v7 = vld [vmem:[%s481_s3] sm:$0xff]  ;;  %343 = vmatprep.mubr.msk.f32.mxu1 %vm378_vm0, %v379_v4  ;;  %v114_v8 = vld [vmem:[%s481_s3 + $0x8] sm:$0xff] }
   0x3   :  { %v115_v9 = vld [vmem:[%s481_s3 + $0x10] sm:$0xff]  ;;  %v116_v10 = vld [vmem:[%s481_s3 + $0x18] sm:$0xff]  ;;  %v357_v11 = vpack.c.bf16 %v30_v6, %v29_v3  ;;  %v360_v12 = vpack.c.bf16 %v114_v8, %v113_v7  ;;  %v117_v14 = vld [vmem:[%s481_s3 + $0x20] sm:$0xff] }
   0x4   :  { %355 = vmatpush3.bf16.msra.mxu0 %v354_v5  ;;  %v363_v13 = vpack.c.bf16 %v116_v10, %v115_v9  ;;  %v118_v15 = vld [vmem:[%s481_s3 + $0x28] sm:$0xff]  ;;  %v26_v16 = vld [vmem:[%s482_s0] sm:$0xff]  ;;  %v119_v18 = vld [vmem:[%s481_s3 + $0x30] sm:$0xff] }
   0x5   :  { %356 = vmatprep.subr.bf16.mxu0 %v377_v0  ;;  %361 = vmatpush3.bf16.msra.mxu1 %v360_v12  ;;  %v366_v17 = vpack.c.bf16 %v118_v15, %v117_v14  ;;  %v120_v19 = vld [vmem:[%s481_s3 + $0x38] sm:$0xff]  ;;  %v293_v21 = vld [vmem:[%s483_s2] ss:$0 sm:$0xff]  ;;  %v204_v27 = vld [vmem:[%s484_s5 + $0x8] sm:$0xff] }
   0x6   :  { %362 = vmatprep.subr.bf16.mxu1 %v377_v0  ;;  %v369_v20 = vpack.c.bf16 %v120_v19, %v119_v18  ;;  %v203_v26 = vld [vmem:[%s484_s5] sm:$0xff] }
   0x7   :  { %v372_v28 = vpack.c.bf16 %v204_v27, %v203_v26  ;;  %v295_v29 = vld [vmem:[%s485_s4] ss:$0 sm:$0xff] }
   0x8   :  { %358 = vmatpush3.bf16.msra.mxu0 %v357_v11  ;;  %v297_v34 = vld [vmem:[%s486_s6] ss:$0 sm:$0xff] }
   0x9   :  { %371 = vmatprep.subr.bf16.mxu0 %v377_v0  ;;  %364 = vmatpush3.bf16.msra.mxu1 %v363_v13 }
   0xa   :  { %365 = vmatprep.subr.bf16.mxu1 %v377_v0 }
   0xb   :  { %325 = vmatmul.mubr.msk.f32.vlgmr.msra.gmra.mrb[0].mxu0 %vm38_vm1, %v26_v16 }
   0xc   :  { %350 = vmatprep.mubr.msk.f32.mxu0 %vm378_vm0, %v379_v4  ;;  %373 = vmatpush3.bf16.msra.mxu0 %v372_v28 }
   0xd   :  { %367 = vmatpush3.bf16.msra.mxu1 %v366_v17 }
   0xe   :  { %368 = vmatprep.subr.bf16.mxu1 %v377_v0 }
  0x11   :  { %370 = vmatpush3.bf16.msra.mxu1 %v369_v20 }
  0xde   :  { %v108_v22 = vpop.f32.mrb[0].mxu0 }
  0xdf   :  { %v109_v23 = vadd.f32 %v293_v21, %v108_v22  ;;  %v326_v24 = vpop.f32.mrb[1].mxu0 }
  0xe1   :  { %v112_v25 = vmax.f32 %v109_v23, 0.0 }
  0xe3   :  { %344 = vmatmul.mubr.msk.f32.vlgmr.msra.gmra.mrb[0].mxu1 %vm128_vm2, %v112_v25 }
 0x1b6   :  { %v198_v30 = vpop.f32.mrb[0].mxu1 }
 0x1b7   :  { %v199_v31 = vadd.f32 %v295_v29, %v198_v30  ;;  %v345_v32 = vpop.f32.mrb[1].mxu1 }
 0x1b9   :  { %v202_v33 = vmax.f32 %v199_v31, 0.0 }
 0x1bb   :  { %351 = vmatmul.mubr.msk.f32.vlgmr.msra.gmra.mrb[2].mxu0 %vm212_vm3, %v202_v33 }
 0x28e   :  { %v282_v35 = vpop.f32.mrb[2].mxu0 }
 0x28f   :  { %v283_v36 = vadd.f32 %v297_v34, %v282_v35  ;;  %v352_v37 = vpop.f32.mrb[3].mxu0 }
 0x291   :  { %v286_v38 = vmax.f32 %v283_v36, 0.0 }
 0x293   :  { %288 = vst.msk [vmem:[%s487_s7] sm:$0xff] %vm287_vm4, %v286_v38 }

// kernel: tpu_custom_call.1
= control target key start
LH: loop header
LB: loop body
LE: loop exit
PB: predicated region body
PF: predicated region fallthrough
CT: control target
= control target key end

     0   :  { %v377_v0 = vmov 0.0|0.0   ;;  %vm378_vm0 = vmmov 0   ;;  %v379_v4 = vmov 0.0   ;;  %vm38_vm1 = vcmask 261120   ;;  %s480_s1 = inlined_call_operand.vmem [shape: f32[32,64], index: 1, kind: input, shape index: {}]   ;;  %s481_s3 = inlined_call_operand.vmem [shape: f32[64,16], index: 3, kind: input, shape index: {}]   ;;  %s482_s0 = inlined_call_operand.vmem [shape: f32[8,32], index: 0, kind: input, shape index: {}]   ;;  %s483_s2 = inlined_call_operand.vmem [shape: f32[1,64], index: 2, kind: input, shape index: {}]   ;;  %s484_s5 = inlined_call_operand.vmem [shape: f32[16,4], index: 5, kind: input, shape index: {}]   ;;  %s485_s4 = inlined_call_operand.vmem [shape: f32[1,16], index: 4, kind: input, shape index: {}]   ;;  %s486_s6 = inlined_call_operand.vmem [shape: f32[1,4], index: 6, kind: input, shape index: {}]   ;;  %s487_s7 = inlined_call_operand.vmem [shape: f32[8,4], index: 7, kind: output, shape index: {}]  }
   0x1   :  { %353 = vmatprep.subr.bf16.mxu0 %v377_v0  ;;  %v27_v1 = vld [vmem:[%s480_s1] sm:$0xff]  ;;  %v28_v2 = vld [vmem:[%s480_s1 + $0x8] sm:$0xff]  ;;  %v29_v3 = vld [vmem:[%s480_s1 + $0x10] sm:$0xff]  ;;  %324 = vmatprep.mubr.msk.f32.mxu0 %vm378_vm0, %v379_v4  ;;  %vm128_vm2 = vcmask 523264   ;;  %vm212_vm3 = vcmask 130048   ;;  %vm287_vm4 = vcmask 31744  }
   0x2   :  { %v354_v5 = vpack.c.bf16 %v28_v2, %v27_v1  ;;  %v30_v6 = vld [vmem:[%s480_s1 + $0x18] sm:$0xff]  ;;  %359 = vmatprep.subr.bf16.mxu1 %v377_v0  ;;  %v113_v7 = vld [vmem:[%s481_s3] sm:$0xff]  ;;  %343 = vmatprep.mubr.msk.f32.mxu1 %vm378_vm0, %v379_v4  ;;  %v114_v8 = vld [vmem:[%s481_s3 + $0x8] sm:$0xff] }
   0x3   :  { %v115_v9 = vld [vmem:[%s481_s3 + $0x10] sm:$0xff]  ;;  %v116_v10 = vld [vmem:[%s481_s3 + $0x18] sm:$0xff]  ;;  %v357_v11 = vpack.c.bf16 %v30_v6, %v29_v3  ;;  %v360_v12 = vpack.c.bf16 %v114_v8, %v113_v7  ;;  %v117_v14 = vld [vmem:[%s481_s3 + $0x20] sm:$0xff] }
   0x4   :  { %355 = vmatpush3.bf16.msra.mxu0 %v354_v5  ;;  %v363_v13 = vpack.c.bf16 %v116_v10, %v115_v9  ;;  %v118_v15 = vld [vmem:[%s481_s3 + $0x28] sm:$0xff]  ;;  %v26_v16 = vld [vmem:[%s482_s0] sm:$0xff]  ;;  %v119_v18 = vld [vmem:[%s481_s3 + $0x30] sm:$0xff] }
   0x5   :  { %356 = vmatprep.subr.bf16.mxu0 %v377_v0  ;;  %361 = vmatpush3.bf16.msra.mxu1 %v360_v12  ;;  %v366_v17 = vpack.c.bf16 %v118_v15, %v117_v14  ;;  %v120_v19 = vld [vmem:[%s481_s3 + $0x38] sm:$0xff]  ;;  %v293_v21 = vld [vmem:[%s483_s2] ss:$0 sm:$0xff]  ;;  %v204_v27 = vld [vmem:[%s484_s5 + $0x8] sm:$0xff] }
   0x6   :  { %362 = vmatprep.subr.bf16.mxu1 %v377_v0  ;;  %v369_v20 = vpack.c.bf16 %v120_v19, %v119_v18  ;;  %v203_v26 = vld [vmem:[%s484_s5] sm:$0xff] }
   0x7   :  { %v372_v28 = vpack.c.bf16 %v204_v27, %v203_v26  ;;  %v295_v29 = vld [vmem:[%s485_s4] ss:$0 sm:$0xff] }
   0x8   :  { %358 = vmatpush3.bf16.msra.mxu0 %v357_v11  ;;  %v297_v34 = vld [vmem:[%s486_s6] ss:$0 sm:$0xff] }
   0x9   :  { %371 = vmatprep.subr.bf16.mxu0 %v377_v0  ;;  %364 = vmatpush3.bf16.msra.mxu1 %v363_v13 }
   0xa   :  { %365 = vmatprep.subr.bf16.mxu1 %v377_v0 }
   0xb   :  { %325 = vmatmul.mubr.msk.f32.vlgmr.msra.gmra.mrb[0].mxu0 %vm38_vm1, %v26_v16 }
   0xc   :  { %350 = vmatprep.mubr.msk.f32.mxu0 %vm378_vm0, %v379_v4  ;;  %373 = vmatpush3.bf16.msra.mxu0 %v372_v28 }
   0xd   :  { %367 = vmatpush3.bf16.msra.mxu1 %v366_v17 }
   0xe   :  { %368 = vmatprep.subr.bf16.mxu1 %v377_v0 }
  0x11   :  { %370 = vmatpush3.bf16.msra.mxu1 %v369_v20 }
  0xde   :  { %v108_v22 = vpop.f32.mrb[0].mxu0 }
  0xdf   :  { %v109_v23 = vadd.f32 %v293_v21, %v108_v22  ;;  %v326_v24 = vpop.f32.mrb[1].mxu0 }
  0xe1   :  { %v112_v25 = vmax.f32 %v109_v23, 0.0 }
  0xe3   :  { %344 = vmatmul.mubr.msk.f32.vlgmr.msra.gmra.mrb[0].mxu1 %vm128_vm2, %v112_v25 }
 0x1b6   :  { %v198_v30 = vpop.f32.mrb[0].mxu1 }
 0x1b7   :  { %v199_v31 = vadd.f32 %v295_v29, %v198_v30  ;;  %v345_v32 = vpop.f32.mrb[1].mxu1 }
 0x1b9   :  { %v202_v33 = vmax.f32 %v199_v31, 0.0 }
 0x1bb   :  { %351 = vmatmul.mubr.msk.f32.vlgmr.msra.gmra.mrb[2].mxu0 %vm212_vm3, %v202_v33 }
 0x28e   :  { %v282_v35 = vpop.f32.mrb[2].mxu0 }
 0x28f   :  { %v283_v36 = vadd.f32 %v297_v34, %v282_v35  ;;  %v352_v37 = vpop.f32.mrb[3].mxu0 }
 0x291   :  { %v286_v38 = vmax.f32 %v283_v36, 0.0 }
 0x293   :  { %288 = vst.msk [vmem:[%s487_s7] sm:$0xff] %vm287_vm4, %v286_v38 }

</bundles_post_ra>
